<compile_context>
chip_gen: v7x
topology: tpu7x:2x2x1
jax: 0.10.0
libtpu: 0.0.40
codegen_flags: <defaults>
</compile_context>

<pallas_src>
import functools

import jax
import jax.numpy as jnp
from jax.experimental import pallas as pl
from jax.experimental.pallas import tpu as pltpu


def _round_up(x, m):
    return (x + m - 1) // m * m


def _pad2d(a, rows, cols):
    return jnp.pad(a, ((0, rows - a.shape[0]), (0, cols - a.shape[1])))


# ----------------------------------------------------------------------------
# Kernel: full decoder MLP for one (TB, latent) batch tile.
#   x (bf16)   : (TB, P_z)
#   w* (bf16)  : padded (in, out) weights
#   b* (f32)   : padded (1, out) biases
#   out (f32)  : (TB, P_out)
# ----------------------------------------------------------------------------
def _decoder_kernel(x_ref,
                    w1_ref, b1_ref,
                    w2_ref, b2_ref,
                    w3_ref, b3_ref,
                    out_ref):
    x = x_ref[...]                                                    # bf16

    h = jnp.dot(x, w1_ref[...], preferred_element_type=jnp.float32)  # f32 acc
    h = jnp.maximum(h + b1_ref[...], 0.0)                            # f32 relu

    h = jnp.dot(h.astype(jnp.bfloat16), w2_ref[...],
                preferred_element_type=jnp.float32)
    h = jnp.maximum(h + b2_ref[...], 0.0)

    y = jnp.dot(h.astype(jnp.bfloat16), w3_ref[...],
                preferred_element_type=jnp.float32)
    y = y + b3_ref[...]

    # sigmoid(y) = 0.5 * (tanh(0.5*y) + 1)  -- tanh uses the EUP slot.
    out_ref[...] = 0.5 * (jnp.tanh(0.5 * y) + 1.0)


# ----------------------------------------------------------------------------
# One-time parameter preprocessing (outside the per-forward hot path):
# zero-pad feature dims to multiples of 128 and cast matmul weights to bf16.
# ----------------------------------------------------------------------------
def prepare_params(params):
    (w1, b1), (w2, b2), (w3, b3) = params
    Dz, D1 = w1.shape
    D2 = w2.shape[1]
    Do = w3.shape[1]
    P_z, P1, P2, Po = (_round_up(d, 128) for d in (Dz, D1, D2, Do))

    w1_p = _pad2d(w1, P_z, P1).astype(jnp.bfloat16)
    b1_p = _pad2d(b1, 1, P1).astype(jnp.float32)
    w2_p = _pad2d(w2, P1, P2).astype(jnp.bfloat16)
    b2_p = _pad2d(b2, 1, P2).astype(jnp.float32)
    w3_p = _pad2d(w3, P2, Po).astype(jnp.bfloat16)
    b3_p = _pad2d(b3, 1, Po).astype(jnp.float32)
    return (w1_p, b1_p, w2_p, b2_p, w3_p, b3_p)


@functools.partial(jax.jit, static_argnames=("d_out", "max_tb"))
def decoder_forward(x, padded_params, *, d_out, max_tb=256):
    """x: (B, latent_size) float32. Returns (B, d_out) float32 in (0, 1)."""
    B, Dz = x.shape
    w1_p, b1_p, w2_p, b2_p, w3_p, b3_p = padded_params
    P_z = w1_p.shape[0]
    P_out = w3_p.shape[1]

    # Large batch tile (multiple of 8 sublanes, capped at 256 rows).
    TB = min(max_tb, _round_up(B, 8))
    B_pad = _round_up(B, TB)

    # Cast activations to bf16 for the MXU and pad to the tiled shape.
    x_p = jnp.pad(x.astype(jnp.bfloat16), ((0, B_pad - B), (0, P_z - Dz)))

    def const_spec(a):  # whole-array block, constant across the grid
        return pl.BlockSpec(a.shape, lambda i: (0, 0))

    grid = (B_pad // TB,)

    out_padded = pl.pallas_call(
        _decoder_kernel,
        out_shape=jax.ShapeDtypeStruct((B_pad, P_out), jnp.float32),
        grid_spec=pltpu.PrefetchScalarGridSpec(
            num_scalar_prefetch=0,
            grid=grid,
            in_specs=[
                pl.BlockSpec((TB, P_z), lambda i: (i, 0)),   # x batch tile
                const_spec(w1_p), const_spec(b1_p),
                const_spec(w2_p), const_spec(b2_p),
                const_spec(w3_p), const_spec(b3_p),
            ],
            out_specs=pl.BlockSpec((TB, P_out), lambda i: (i, 0)),
        ),
        compiler_params=pltpu.CompilerParams(
            dimension_semantics=("parallel",),
        ),
    )(x_p, w1_p, b1_p, w2_p, b2_p, w3_p, b3_p)

    return out_padded[:B, :d_out]


# ----------------------------------------------------------------------------
# Parameter init (mimics nn.Linear default: U[-1/sqrt(fan_in), +1/sqrt(fan_in)])
# and a pure-JAX f32 reference for correctness checking.
# ----------------------------------------------------------------------------
def init_params(key, latent_size=8, channels=1, output_size=28):
    d_out = channels * output_size * output_size
    dims = [
        (latent_size, 10 * 10),  # linear1
        (10 * 10, 14 * 14),      # linear2
        (14 * 14, d_out),        # linear3
    ]
    params = []
    keys = jax.random.split(key, 2 * len(dims))
    for idx, (fan_in, fan_out) in enumerate(dims):
        bound = 1.0 / (fan_in ** 0.5)
        w = jax.random.uniform(keys[2 * idx], (fan_in, fan_out),
                               jnp.float32, -bound, bound)
        b = jax.random.uniform(keys[2 * idx + 1], (1, fan_out),
                               jnp.float32, -bound, bound)
        params.append((w, b))
    return tuple(params)


def _reference_forward(x, params):
    (w1, b1), (w2, b2), (w3, b3) = params
    h = jax.nn.relu(x @ w1 + b1)
    h = jax.nn.relu(h @ w2 + b2)
    return jax.nn.sigmoid(h @ w3 + b3)


if __name__ == "__main__":
    key = jax.random.PRNGKey(0)
    k_param, k_x1, k_x2 = jax.random.split(key, 3)

    latent, channels, out_size = 8, 1, 28
    d_out = channels * out_size * out_size

    params = init_params(k_param, latent_size=latent,
                         channels=channels, output_size=out_size)
    padded_params = prepare_params(params)          # one-time, off hot path

    # Small deterministic input consistent with the module: (batch=2, latent=8).
    x_small = jax.random.normal(k_x1, (2, latent), jnp.float32)
    y_small = jax.block_until_ready(
        decoder_forward(x_small, padded_params, d_out=d_out))
    y_small_ref = _reference_forward(x_small, params)
    assert y_small.shape == (2, d_out)
    # bf16 matmul operands w/ f32 accumulation -> ~1e-2 abs tolerance vs f32 ref
    assert jnp.max(jnp.abs(y_small - y_small_ref)) < 2e-2

    # Larger batch exercising the 256-row tile and a multi-step parallel grid.
    x_big = jax.random.normal(k_x2, (300, latent), jnp.float32)
    y_big = jax.block_until_ready(
        decoder_forward(x_big, padded_params, d_out=d_out))
    y_big_ref = _reference_forward(x_big, params)
    assert y_big.shape == (300, d_out)
    assert jnp.max(jnp.abs(y_big - y_big_ref)) < 2e-2

    print("KERNEL_OK")
</pallas_src>

<mosaic_0001>
module attributes {stable_mosaic.version = 11 : i64} {
  func.func @_decoder_kernel(%arg0: i32, %arg1: memref<8x128xbf16, #tpu.memory_space<vmem>>, %arg2: memref<128x128xbf16, #tpu.memory_space<vmem>>, %arg3: memref<1x128xf32, #tpu.memory_space<vmem>>, %arg4: memref<128x256xbf16, #tpu.memory_space<vmem>>, %arg5: memref<1x256xf32, #tpu.memory_space<vmem>>, %arg6: memref<256x896xbf16, #tpu.memory_space<vmem>>, %arg7: memref<1x896xf32, #tpu.memory_space<vmem>>, %arg8: memref<8x896xf32, #tpu.memory_space<vmem>>) attributes {dimension_semantics = [#tpu.dimension_semantics<parallel>], iteration_bounds = array<i64: 1>, scalar_prefetch = 0 : i64, scratch_operands = 0 : i64, tpu.core_type = #tpu.core_type<tc>, window_params = [{transform_indices = @transform_0, window_bounds = array<i64: 8, 128>}, {pipeline_mode = #tpu.pipeline_mode<synchronous>, transform_indices = @transform_1, window_bounds = array<i64: 128, 128>}, {pipeline_mode = #tpu.pipeline_mode<synchronous>, transform_indices = @transform_2, window_bounds = array<i64: 1, 128>}, {pipeline_mode = #tpu.pipeline_mode<synchronous>, transform_indices = @transform_3, window_bounds = array<i64: 128, 256>}, {pipeline_mode = #tpu.pipeline_mode<synchronous>, transform_indices = @transform_4, window_bounds = array<i64: 1, 256>}, {pipeline_mode = #tpu.pipeline_mode<synchronous>, transform_indices = @transform_5, window_bounds = array<i64: 256, 896>}, {pipeline_mode = #tpu.pipeline_mode<synchronous>, transform_indices = @transform_6, window_bounds = array<i64: 1, 896>}, {transform_indices = @transform_7, window_bounds = array<i64: 8, 896>}]} {
    %c0 = arith.constant 0 : index
    %c0_0 = arith.constant 0 : index
    %0 = vector.load %arg1[%c0, %c0_0] : memref<8x128xbf16, #tpu.memory_space<vmem>>, vector<8x128xbf16>
    %c0_1 = arith.constant 0 : index
    %c0_2 = arith.constant 0 : index
    %1 = vector.load %arg2[%c0_1, %c0_2] : memref<128x128xbf16, #tpu.memory_space<vmem>>, vector<128x128xbf16>
    %cst = arith.constant dense<0.000000e+00> : vector<8x128xf32>
    %2 = tpu.matmul %0, %1, %cst {dimension_numbers = #tpu.dot_dimension_numbers<[1], [0], [0], [1], [0, 0, 1, 1], [], []>} : vector<8x128xbf16>, vector<128x128xbf16>, vector<8x128xf32> -> vector<8x128xf32>
    %c0_3 = arith.constant 0 : index
    %c0_4 = arith.constant 0 : index
    %3 = vector.load %arg3[%c0_3, %c0_4] : memref<1x128xf32, #tpu.memory_space<vmem>>, vector<1x128xf32>
    %4 = vector.broadcast %3 : vector<1x128xf32> to vector<8x128xf32>
    %5 = arith.addf %2, %4 : vector<8x128xf32>
    %cst_5 = arith.constant 0.000000e+00 : f32
    %6 = vector.broadcast %cst_5 : f32 to vector<8x128xf32>
    %7 = arith.maximumf %5, %6 : vector<8x128xf32>
    %8 = arith.truncf %7 : vector<8x128xf32> to vector<8x128xbf16>
    %c0_6 = arith.constant 0 : index
    %c0_7 = arith.constant 0 : index
    %9 = vector.load %arg4[%c0_6, %c0_7] : memref<128x256xbf16, #tpu.memory_space<vmem>>, vector<128x256xbf16>
    %cst_8 = arith.constant dense<0.000000e+00> : vector<8x256xf32>
    %10 = tpu.matmul %8, %9, %cst_8 {dimension_numbers = #tpu.dot_dimension_numbers<[1], [0], [0], [1], [0, 0, 1, 1], [], []>} : vector<8x128xbf16>, vector<128x256xbf16>, vector<8x256xf32> -> vector<8x256xf32>
    %c0_9 = arith.constant 0 : index
    %c0_10 = arith.constant 0 : index
    %11 = vector.load %arg5[%c0_9, %c0_10] : memref<1x256xf32, #tpu.memory_space<vmem>>, vector<1x256xf32>
    %12 = vector.broadcast %11 : vector<1x256xf32> to vector<8x256xf32>
    %13 = arith.addf %10, %12 : vector<8x256xf32>
    %cst_11 = arith.constant 0.000000e+00 : f32
    %14 = vector.broadcast %cst_11 : f32 to vector<8x256xf32>
    %15 = arith.maximumf %13, %14 : vector<8x256xf32>
    %16 = arith.truncf %15 : vector<8x256xf32> to vector<8x256xbf16>
    %c0_12 = arith.constant 0 : index
    %c0_13 = arith.constant 0 : index
    %17 = vector.load %arg6[%c0_12, %c0_13] : memref<256x896xbf16, #tpu.memory_space<vmem>>, vector<256x896xbf16>
    %cst_14 = arith.constant dense<0.000000e+00> : vector<8x896xf32>
    %18 = tpu.matmul %16, %17, %cst_14 {dimension_numbers = #tpu.dot_dimension_numbers<[1], [0], [0], [1], [0, 0, 1, 1], [], []>} : vector<8x256xbf16>, vector<256x896xbf16>, vector<8x896xf32> -> vector<8x896xf32>
    %c0_15 = arith.constant 0 : index
    %c0_16 = arith.constant 0 : index
    %19 = vector.load %arg7[%c0_15, %c0_16] : memref<1x896xf32, #tpu.memory_space<vmem>>, vector<1x896xf32>
    %20 = vector.broadcast %19 : vector<1x896xf32> to vector<8x896xf32>
    %21 = arith.addf %18, %20 : vector<8x896xf32>
    %cst_17 = arith.constant 5.000000e-01 : f32
    %22 = vector.broadcast %cst_17 : f32 to vector<8x896xf32>
    %23 = arith.mulf %22, %21 : vector<8x896xf32>
    %24 = math.tanh %23 : vector<8x896xf32>
    %cst_18 = arith.constant 1.000000e+00 : f32
    %25 = vector.broadcast %cst_18 : f32 to vector<8x896xf32>
    %26 = arith.addf %24, %25 : vector<8x896xf32>
    %cst_19 = arith.constant 5.000000e-01 : f32
    %27 = vector.broadcast %cst_19 : f32 to vector<8x896xf32>
    %28 = arith.mulf %27, %26 : vector<8x896xf32>
    %c0_20 = arith.constant 0 : index
    %c0_21 = arith.constant 0 : index
    %29 = vector.load %arg8[%c0_20, %c0_21] : memref<8x896xf32, #tpu.memory_space<vmem>>, vector<8x896xf32>
    tpu.vector_store %arg8[%c0_20, %c0_21], %28 {strides = array<i32>} : memref<8x896xf32, #tpu.memory_space<vmem>>, vector<8x896xf32>,
    return
  }
  func.func @transform_0(%arg0: i32) -> (i32, i32) {
    %c0_i32 = arith.constant 0 : i32
    %c0_i32_0 = arith.constant 0 : i32
    return %arg0, %c0_i32 : i32, i32
  }
  func.func @transform_1(%arg0: i32) -> (i32, i32) {
    %c0_i32 = arith.constant 0 : i32
    %c0_i32_0 = arith.constant 0 : i32
    %c0_i32_1 = arith.constant 0 : i32
    return %c0_i32, %c0_i32_0 : i32, i32
  }
  func.func @transform_2(%arg0: i32) -> (i32, i32) {
    %c0_i32 = arith.constant 0 : i32
    %c0_i32_0 = arith.constant 0 : i32
    %c0_i32_1 = arith.constant 0 : i32
    return %c0_i32, %c0_i32_0 : i32, i32
  }
  func.func @transform_3(%arg0: i32) -> (i32, i32) {
    %c0_i32 = arith.constant 0 : i32
    %c0_i32_0 = arith.constant 0 : i32
    %c0_i32_1 = arith.constant 0 : i32
    return %c0_i32, %c0_i32_0 : i32, i32
  }
  func.func @transform_4(%arg0: i32) -> (i32, i32) {
    %c0_i32 = arith.constant 0 : i32
    %c0_i32_0 = arith.constant 0 : i32
    %c0_i32_1 = arith.constant 0 : i32
    return %c0_i32, %c0_i32_0 : i32, i32
  }
  func.func @transform_5(%arg0: i32) -> (i32, i32) {
    %c0_i32 = arith.constant 0 : i32
    %c0_i32_0 = arith.constant 0 : i32
    %c0_i32_1 = arith.constant 0 : i32
    return %c0_i32, %c0_i32_0 : i32, i32
  }
  func.func @transform_6(%arg0: i32) -> (i32, i32) {
    %c0_i32 = arith.constant 0 : i32
    %c0_i32_0 = arith.constant 0 : i32
    %c0_i32_1 = arith.constant 0 : i32
    return %c0_i32, %c0_i32_0 : i32, i32
  }
  func.func @transform_7(%arg0: i32) -> (i32, i32) {
    %c0_i32 = arith.constant 0 : i32
    %c0_i32_0 = arith.constant 0 : i32
    return %arg0, %c0_i32 : i32, i32
  }
}

</mosaic_0001>

<bundles_post_ra>
// kernel: decoder_forward.1
= control target key start
LH: loop header
LB: loop body
LE: loop exit
PB: predicated region body
PF: predicated region fallthrough
CT: control target
= control target key end

     0   :  { %12 = vsyncpa [#allocation3], 0  ;;  %s1900_s0 = inlined_call_operand.vmem [shape: bf16[8,128], index: 0, kind: input, shape index: {}]   ;;  %s1901_s1 = inlined_call_operand.hbm [shape: bf16[128,128], index: 1, kind: input, shape index: {}]   ;;  %s1902_s2 = inlined_call_operand.vmem [shape: f32[1,128], index: 2, kind: input, shape index: {}]   ;;  %s1903_s3 = inlined_call_operand.hbm [shape: bf16[128,256], index: 3, kind: input, shape index: {}]   ;;  %s1904_s4 = inlined_call_operand.vmem [shape: f32[1,256], index: 4, kind: input, shape index: {}]   ;;  %s1905_s5 = inlined_call_operand.hbm [shape: bf16[256,896], index: 5, kind: input, shape index: {}]   ;;  %s1906_s6 = inlined_call_operand.vmem [shape: f32[1,896], index: 6, kind: input, shape index: {}]   ;;  %s1907_s7 = inlined_call_operand.vmem [shape: f32[8,896], index: 7, kind: output, shape index: {}]  }
   0x1   :  { %13 = vsyncpa [#allocation5], 0  ;;  %s1756_s24 = smov [#allocation4]   ;;  %s1686_s28 = scalar_lea.hbm %s1903_s3, 2048 }
   0x2   :  { %s35_s25 = sshll.u32 %s1756_s24, 4  ;;  %p1687_p0 = scmp.ne.s32.totalorder %s1903_s3, %s1686_s28  ;;  %s36_s25 = int_to_ptr.vmem [resolvable:$true] %s35_s25 }
   0x3   :  { %p1690_p1 = scmp.lt.u32.totalorder %s1686_s28, %s1903_s3 }
   0x5   :  { %p1692_p2 = pnand %p1690_p1, %p1687_p0 }
   0x7   :  { %1695 = shalt.err (!%p1692_p2)
}
   0x8   :  { %s1696_s10 = scalar_lea.vmem %s36_s25, 2048  ;;  %p1701_p4 = scmp.lt.s32.totalorder %s36_s25, %s36_s25 }
   0x9   :  { %p1697_p3 = scmp.ne.s32.totalorder %s36_s25, %s1696_s10  ;;  %p1702_p5 = scmp.lt.s32.totalorder %s1696_s10, %s1696_s10 }
   0xb   :  { %p1703_p6 = por %p1702_p5, %p1701_p4 }
   0xd   :  { %p1704_p7 = pnand %p1703_p6, %p1697_p3 }
   0xf   :  { %1707 = shalt.err (!%p1704_p7)
}
  0x10   :  { %s1757_s11 = smov 128   ;;  %s1758_s12 = smov 8  }
  0x11   :  { %41 = dma.hbm_to_vmem [thread:$0]  %s1903_s3, 2048, %s36_s25, [#allocation5], %s1757_s11, %s1757_s11, %s1758_s12  }
  0x12   :  { %s1759_s15 = smov [#allocation2]   ;;  %s1708_s19 = scalar_lea.hbm %s1901_s1, 1024 }
  0x13   :  { %s21_s16 = sshll.u32 %s1759_s15, 4  ;;  %p1709_p8 = scmp.ne.s32.totalorder %s1901_s1, %s1708_s19  ;;  %s22_s16 = int_to_ptr.vmem [resolvable:$true] %s21_s16 }
  0x14   :  { %p1712_p9 = scmp.lt.u32.totalorder %s1708_s19, %s1901_s1 }
  0x16   :  { %p1714_p10 = pnand %p1712_p9, %p1709_p8 }
  0x18   :  { %1717 = shalt.err (!%p1714_p10)
}
  0x19   :  { %s1718_s24 = scalar_lea.vmem %s22_s16, 1024  ;;  %p1723_p12 = scmp.lt.s32.totalorder %s22_s16, %s22_s16 }
  0x1a   :  { %p1719_p11 = scmp.ne.s32.totalorder %s22_s16, %s1718_s24  ;;  %p1724_p13 = scmp.lt.s32.totalorder %s1718_s24, %s1718_s24 }
  0x1c   :  { %p1725_p0 = por %p1724_p13, %p1723_p12 }
  0x1e   :  { %p1726_p1 = pnand %p1725_p0, %p1719_p11 }
  0x20   :  { %1729 = shalt.err (!%p1726_p1)
}
  0x21   :  { %s1760_s3 = smov 64   ;;  %s1761_s25 = smov 4  }
  0x22   :  { %27 = dma.hbm_to_vmem [thread:$0]  %s1901_s1, 1024, %s22_s16, [#allocation3], %s1760_s3, %s1760_s3, %s1761_s25  }
  0x23   :  { %s1762_s28 = smov [#allocation6]   ;;  %s1730_s9 = scalar_lea.hbm %s1905_s5, 14336 }
  0x24   :  { %s49_s29 = sshll.u32 %s1762_s28, 4  ;;  %p1731_p2 = scmp.ne.s32.totalorder %s1905_s5, %s1730_s9  ;;  %s50_s29 = int_to_ptr.vmem [resolvable:$true] %s49_s29 }
  0x25   :  { %p1734_p3 = scmp.lt.u32.totalorder %s1730_s9, %s1905_s5 }
  0x27   :  { %p1736_p4 = pnand %p1734_p3, %p1731_p2 }
  0x29   :  { %1739 = shalt.err (!%p1736_p4)
}
  0x2a   :  { %s1740_s14 = scalar_lea.vmem %s50_s29, 14336  ;;  %p1745_p6 = scmp.lt.s32.totalorder %s50_s29, %s50_s29 }
  0x2b   :  { %p1741_p5 = scmp.ne.s32.totalorder %s50_s29, %s1740_s14  ;;  %p1746_p7 = scmp.lt.s32.totalorder %s1740_s14, %s1740_s14 }
  0x2d   :  { %p1747_p8 = por %p1746_p7, %p1745_p6 }
  0x2f   :  { %p1748_p9 = pnand %p1747_p8, %p1741_p5 }
  0x31   :  { %1751 = shalt.err (!%p1748_p9)
}
  0x32   :  { %s1763_s1 = smov 448   ;;  %s1764_s15 = smov 28  }
  0x33   :  { %55 = dma.hbm_to_vmem [thread:$0]  %s1905_s5, 14336, %s50_s29, [#allocation5], %s1763_s1, %s1763_s1, %s1764_s15  }
  0x34   :  { %1752 = dma.done.wait [#allocation3], 1024  }
  0x35   :  { %1753 = vsyncadd [#allocation3], 4294966272 }
  0x36   :  { %1754 = dma.done.wait [#allocation5], 16384  }
  0x37   :  { %1755 = vsyncadd [#allocation5], 4294950912  ;;  %v1765_v0 = vmov 0.0   ;;  %vm1766_vm0 = vmmov 0   ;;  %v1480_v1 = vld [vmem:[#allocation2] sm:$0xff]   ;;  %v1481_v2 = vld [vmem:[#allocation2 + $0x8] sm:$0xff]  }
  0x38   :  { %1448 = vmatprep.subr.bf16.mxu0 %v1765_v0  ;;  %1464 = vmatprep.mubr.msk.bf16.mxu0 %vm1766_vm0, %v1765_v0  ;;  %v1482_v3 = vld [vmem:[#allocation2 + $0x10] sm:$0xff]   ;;  %v1488_v4 = vld [vmem:[#allocation4 + $0x4] ss:$8 sps:$4 sm:$0xff]   ;;  %v1490_v5 = vld [vmem:[#allocation4] ss:$8 sps:$4 sm:$0xff]   ;;  %v1767_v26 = vmov 0  }
  0x39   :  { %1449 = vmatpush3.bf16.msra.mxu0 %v1480_v1  ;;  %v1483_v6 = vld [vmem:[#allocation2 + $0x18] sm:$0xff]   ;;  %290 = vmatprep.subr.bf16.mxu1 %v1488_v4  ;;  %v1494_v9 = vld [vmem:[#allocation4 + $0x24] ss:$8 sps:$4 sm:$0xff]   ;;  %v1496_v11 = vld [vmem:[#allocation4 + $0x20] ss:$8 sps:$4 sm:$0xff]  }
  0x3a   :  { %1450 = vmatprep.subr.bf16.mxu0 %v1765_v0  ;;  %v1491_v7 = vld [vmem:[#allocation4 + $0x14] ss:$8 sps:$4 sm:$0xff]   ;;  %291 = vmatpush1.bf16.msra.mxu1 %v1490_v5  ;;  %v1493_v8 = vld [vmem:[#allocation4 + $0x10] ss:$8 sps:$4 sm:$0xff]   ;;  %v1484_v10 = vld [vmem:[#allocation2 + $0x20] sm:$0xff]  }
  0x3b   :  { %292 = vmatprep.subr.bf16.mxu1 %v1491_v7  ;;  %v1485_v12 = vld [vmem:[#allocation2 + $0x28] sm:$0xff]   ;;  %v1497_v13 = vld [vmem:[#allocation4 + $0x34] ss:$8 sps:$4 sm:$0xff]   ;;  %v1499_v14 = vld [vmem:[#allocation4 + $0x30] ss:$8 sps:$4 sm:$0xff]   ;;  %322 = vmatprep.mubr.bf16.mxu1 %v1767_v26 }
  0x3c   :  { %v1500_v15 = vld [vmem:[#allocation4 + $0x44] ss:$8 sps:$4 sm:$0xff]   ;;  %v1486_v16 = vld [vmem:[#allocation2 + $0x30] sm:$0xff]   ;;  %v1502_v17 = vld [vmem:[#allocation4 + $0x40] ss:$8 sps:$4 sm:$0xff]  }
  0x3d   :  { %1451 = vmatpush3.bf16.msra.mxu0 %v1481_v2  ;;  %v1503_v18 = vld [vmem:[#allocation4 + $0x54] ss:$8 sps:$4 sm:$0xff]   ;;  %v1505_v20 = vld [vmem:[#allocation4 + $0x50] ss:$8 sps:$4 sm:$0xff]   ;;  %v1506_v21 = vld [vmem:[#allocation4 + $0x64] ss:$8 sps:$4 sm:$0xff]  }
  0x3e   :  { %1452 = vmatprep.subr.bf16.mxu0 %v1765_v0  ;;  %293 = vmatpush1.bf16.msra.mxu1 %v1493_v8  ;;  %v1487_v19 = vld [vmem:[#allocation2 + $0x38] sm:$0xff]   ;;  %v1508_v23 = vld [vmem:[#allocation4 + $0x60] ss:$8 sps:$4 sm:$0xff]   ;;  %v1526_v32 = vld [vmem:[#allocation6 + $0x74] ss:$28 sps:$4 sm:$0xff]  }
  0x3f   :  { %294 = vmatprep.subr.bf16.mxu1 %v1494_v9  ;;  %v68_v22 = vld [vmem:[%s1900_s0] sm:$0xf]  ;;  %v1509_v24 = vld [vmem:[#allocation4 + $0x74] ss:$8 sps:$4 sm:$0xff]   ;;  %v1514_v28 = vld [vmem:[#allocation6 + $0x4] ss:$28 sps:$4 sm:$0xff]  }
  0x40   :  { %v1511_v25 = vld [vmem:[#allocation4 + $0x70] ss:$8 sps:$4 sm:$0xff]   ;;  %v1512_v27 = vld [vmem:[#allocation6] ss:$28 sps:$4 sm:$0xff]   ;;  %v1517_v29 = vld [vmem:[#allocation6 + $0xc] ss:$28 sps:$4 sm:$0xff]  }
  0x41   :  { %1453 = vmatpush3.bf16.msra.mxu0 %v1482_v3  ;;  %v1520_v30 = vld [vmem:[#allocation6 + $0x3c] ss:$28 sps:$4 sm:$0xff]   ;;  %v1524_v33 = vld [vmem:[#allocation6 + $0x70] ss:$28 sps:$4 sm:$0xff]   ;;  %v1530_v35 = vld [vmem:[#allocation6 + $0xa8] ss:$28 sps:$4 sm:$0xff]  }
  0x42   :  { %1454 = vmatprep.subr.bf16.mxu0 %v1765_v0  ;;  %295 = vmatpush1.bf16.msra.mxu1 %v1496_v11  ;;  %v1518_v31 = vld [vmem:[#allocation6 + $0x38] ss:$28 sps:$4 sm:$0xff]   ;;  %v1532_v34 = vld [vmem:[#allocation6 + $0xac] ss:$28 sps:$4 sm:$0xff]   ;;  %v1538_v36 = vld [vmem:[#allocation6 + $0xe4] ss:$28 sps:$4 sm:$0xff]  }
  0x43   :  { %296 = vmatprep.subr.bf16.mxu1 %v1497_v13  ;;  %v1536_v37 = vld [vmem:[#allocation6 + $0xe0] ss:$28 sps:$4 sm:$0xff]   ;;  %v1542_v39 = vld [vmem:[#allocation6 + $0x118] ss:$28 sps:$4 sm:$0xff]   ;;  %v1548_v41 = vld [vmem:[#allocation6 + $0x150] ss:$28 sps:$4 sm:$0xff]  }
  0x44   :  { %v1544_v38 = vld [vmem:[#allocation6 + $0x11c] ss:$28 sps:$4 sm:$0xff]   ;;  %v1550_v40 = vld [vmem:[#allocation6 + $0x154] ss:$28 sps:$4 sm:$0xff]   ;;  %v1556_v42 = vld [vmem:[#allocation6 + $0x18c] ss:$28 sps:$4 sm:$0xff]  }
  0x45   :  { %1455 = vmatpush3.bf16.msra.mxu0 %v1483_v6  ;;  %v1554_v43 = vld [vmem:[#allocation6 + $0x188] ss:$28 sps:$4 sm:$0xff]   ;;  %v1560_v45 = vld [vmem:[#allocation6 + $0x1c0] ss:$28 sps:$4 sm:$0xff]   ;;  %v1566_v47 = vld [vmem:[#allocation6 + $0x1f8] ss:$28 sps:$4 sm:$0xff]  }
  0x46   :  { %1456 = vmatprep.subr.bf16.mxu0 %v1765_v0  ;;  %297 = vmatpush1.bf16.msra.mxu1 %v1499_v14  ;;  %v1562_v44 = vld [vmem:[#allocation6 + $0x1c4] ss:$28 sps:$4 sm:$0xff]   ;;  %v1568_v46 = vld [vmem:[#allocation6 + $0x1fc] ss:$28 sps:$4 sm:$0xff]   ;;  %v1574_v48 = vld [vmem:[#allocation6 + $0x234] ss:$28 sps:$4 sm:$0xff]  }
  0x47   :  { %298 = vmatprep.subr.bf16.mxu1 %v1500_v15  ;;  %v1572_v49 = vld [vmem:[#allocation6 + $0x230] ss:$28 sps:$4 sm:$0xff]   ;;  %v1578_v51 = vld [vmem:[#allocation6 + $0x268] ss:$28 sps:$4 sm:$0xff]   ;;  %v1584_v53 = vld [vmem:[#allocation6 + $0x2a0] ss:$28 sps:$4 sm:$0xff]  }
  0x48   :  { %v1580_v50 = vld [vmem:[#allocation6 + $0x26c] ss:$28 sps:$4 sm:$0xff]   ;;  %v1586_v52 = vld [vmem:[#allocation6 + $0x2a4] ss:$28 sps:$4 sm:$0xff]   ;;  %v1592_v54 = vld [vmem:[#allocation6 + $0x2dc] ss:$28 sps:$4 sm:$0xff]  }
  0x49   :  { %1457 = vmatpush3.bf16.msra.mxu0 %v1484_v10  ;;  %v1590_v55 = vld [vmem:[#allocation6 + $0x2d8] ss:$28 sps:$4 sm:$0xff]   ;;  %v1515_v63 = vld [vmem:[#allocation6 + $0x8] ss:$28 sps:$4 sm:$0xff]   ;;  %v1521_v2 = vld [vmem:[#allocation6 + $0x40] ss:$28 sps:$4 sm:$0xff]  }
  0x4a   :  { %1458 = vmatprep.subr.bf16.mxu0 %v1765_v0  ;;  %299 = vmatpush1.bf16.msra.mxu1 %v1502_v17  ;;  %v1280_v56 = vld [vmem:[%s1902_s2] ss:$0 sm:$0xff]  ;;  %v1523_v1 = vld [vmem:[#allocation6 + $0x44] ss:$28 sps:$4 sm:$0xff]   ;;  %v1535_v5 = vld [vmem:[#allocation6 + $0xb4] ss:$28 sps:$4 sm:$0xff]  }
  0x4b   :  { %300 = vmatprep.subr.bf16.mxu1 %v1503_v18  ;;  %v1529_v3 = vld [vmem:[#allocation6 + $0x7c] ss:$28 sps:$4 sm:$0xff]   ;;  %v1533_v6 = vld [vmem:[#allocation6 + $0xb0] ss:$28 sps:$4 sm:$0xff]   ;;  %v1539_v8 = vld [vmem:[#allocation6 + $0xe8] ss:$28 sps:$4 sm:$0xff]  }
  0x4c   :  { %v1527_v4 = vld [vmem:[#allocation6 + $0x78] ss:$28 sps:$4 sm:$0xff]   ;;  %v1541_v7 = vld [vmem:[#allocation6 + $0xec] ss:$28 sps:$4 sm:$0xff]   ;;  %v1547_v9 = vld [vmem:[#allocation6 + $0x124] ss:$28 sps:$4 sm:$0xff]  }
  0x4d   :  { %1459 = vmatpush3.bf16.msra.mxu0 %v1485_v12  ;;  %v1545_v10 = vld [vmem:[#allocation6 + $0x120] ss:$28 sps:$4 sm:$0xff]   ;;  %v1551_v12 = vld [vmem:[#allocation6 + $0x158] ss:$28 sps:$4 sm:$0xff]   ;;  %v1557_v14 = vld [vmem:[#allocation6 + $0x190] ss:$28 sps:$4 sm:$0xff]  }
  0x4e   :  { %1460 = vmatprep.subr.bf16.mxu0 %v1765_v0  ;;  %301 = vmatpush1.bf16.msra.mxu1 %v1505_v20  ;;  %v1553_v11 = vld [vmem:[#allocation6 + $0x15c] ss:$28 sps:$4 sm:$0xff]   ;;  %v1559_v13 = vld [vmem:[#allocation6 + $0x194] ss:$28 sps:$4 sm:$0xff]   ;;  %v1565_v15 = vld [vmem:[#allocation6 + $0x1cc] ss:$28 sps:$4 sm:$0xff]  }
  0x4f   :  { %302 = vmatprep.subr.bf16.mxu1 %v1506_v21  ;;  %v1571_v17 = vld [vmem:[#allocation6 + $0x204] ss:$28 sps:$4 sm:$0xff]   ;;  %v1575_v20 = vld [vmem:[#allocation6 + $0x238] ss:$28 sps:$4 sm:$0xff]  }
  0x50   :  { %v1569_v18 = vld [vmem:[#allocation6 + $0x200] ss:$28 sps:$4 sm:$0xff]   ;;  %v1583_v21 = vld [vmem:[#allocation6 + $0x274] ss:$28 sps:$4 sm:$0xff]  }
  0x51   :  { %1461 = vmatpush3.bf16.msra.mxu0 %v1486_v16  ;;  %v1563_v16 = vld [vmem:[#allocation6 + $0x1c8] ss:$28 sps:$4 sm:$0xff]   ;;  %v1593_v26 = vld [vmem:[#allocation6 + $0x2e0] ss:$28 sps:$4 sm:$0xff]  }
  0x52   :  { %1462 = vmatprep.subr.bf16.mxu0 %v1765_v0  ;;  %303 = vmatpush1.bf16.msra.mxu1 %v1508_v23  ;;  %v1589_v23 = vld [vmem:[#allocation6 + $0x2ac] ss:$28 sps:$4 sm:$0xff]  }
  0x53   :  { %304 = vmatprep.subr.bf16.mxu1 %v1509_v24  ;;  %v1587_v24 = vld [vmem:[#allocation6 + $0x2a8] ss:$28 sps:$4 sm:$0xff]  }
  0x55   :  { %1463 = vmatpush3.bf16.msra.mxu0 %v1487_v19  ;;  %v1577_v19 = vld [vmem:[#allocation6 + $0x23c] ss:$28 sps:$4 sm:$0xff]  }
  0x56   :  { %305 = vmatpush1.bf16.msra.mxu1 %v1511_v25  ;;  %1076 = vmatprep.subr.bf16.mxu0 %v1514_v28  ;;  %v1595_v25 = vld [vmem:[#allocation6 + $0x2e4] ss:$28 sps:$4 sm:$0xff]   ;;  %v1601_v28 = vld [vmem:[#allocation6 + $0x31c] ss:$28 sps:$4 sm:$0xff]  }
  0x57   :  { %1117 = vmatprep.subr.bf16.mxu1 %v1517_v29  ;;  %v1596_v29 = vld [vmem:[#allocation6 + $0x310] ss:$28 sps:$4 sm:$0xff]  }
  0x58   :  { %1465 = vmatmul.mubr.bf16.vlgmr.msra.gmra.mrb[0].mxu0 %v68_v22  ;;  %v1581_v22 = vld [vmem:[#allocation6 + $0x270] ss:$28 sps:$4 sm:$0xff]  }
  0x59   :  { %1077 = vmatpush1.bf16.msra.mxu0 %v1512_v27  ;;  %v1598_v27 = vld [vmem:[#allocation6 + $0x314] ss:$28 sps:$4 sm:$0xff]  }
  0x5a   :  { %1078 = vmatprep.subr.bf16.mxu0 %v1520_v30  ;;  %v1599_v30 = vld [vmem:[#allocation6 + $0x318] ss:$28 sps:$4 sm:$0xff]  }
  0x5d   :  { %1079 = vmatpush1.bf16.msra.mxu0 %v1518_v31  ;;  %v1604_v31 = vld [vmem:[#allocation6 + $0x34c] ss:$28 sps:$4 sm:$0xff]  }
  0x5e   :  { %1080 = vmatprep.subr.bf16.mxu0 %v1526_v32  ;;  %v1607_v32 = vld [vmem:[#allocation6 + $0x354] ss:$28 sps:$4 sm:$0xff]  }
  0x61   :  { %1081 = vmatpush1.bf16.msra.mxu0 %v1524_v33  ;;  %v1602_v33 = vld [vmem:[#allocation6 + $0x348] ss:$28 sps:$4 sm:$0xff]  }
  0x62   :  { %1082 = vmatprep.subr.bf16.mxu0 %v1532_v34  ;;  %v1605_v34 = vld [vmem:[#allocation6 + $0x350] ss:$28 sps:$4 sm:$0xff]  }
  0x65   :  { %1083 = vmatpush1.bf16.msra.mxu0 %v1530_v35  ;;  %v1610_v35 = vld [vmem:[#allocation6 + $0x14] ss:$28 sps:$4 sm:$0xff]  }
  0x66   :  { %1084 = vmatprep.subr.bf16.mxu0 %v1538_v36  ;;  %v1611_v36 = vld [vmem:[#allocation6 + $0x1d8] ss:$28 sps:$4 sm:$0xff]  }
  0x69   :  { %1085 = vmatpush1.bf16.msra.mxu0 %v1536_v37  ;;  %v200_v37 = vlaneseq }
  0x6a   :  { %1086 = vmatprep.subr.bf16.mxu0 %v1544_v38 }
  0x6b   :  { %v1850_v38 = vshrl.u32 %v200_v37, 7  ;;  %v463_v37 = vld [vmem:[%s1906_s6] sm:$0xff] }
  0x6d   :  { %1087 = vmatpush1.bf16.msra.mxu0 %v1542_v39  ;;  %v202_v39 = vsub.s32 0, %v1850_v38 }
  0x6e   :  { %1088 = vmatprep.subr.bf16.mxu0 %v1550_v40  ;;  %v198_v40 = vld [vmem:[%s1904_s4] sm:$0x3] }
  0x71   :  { %1089 = vmatpush1.bf16.msra.mxu0 %v1548_v41  ;;  %v206_v41 = vsub.s32 1, %v1850_v38 }
  0x72   :  { %1090 = vmatprep.subr.bf16.mxu0 %v1556_v42  ;;  %v203_v42 = vrot.slane %v198_v40, %v202_v39 }
  0x75   :  { %1091 = vmatpush1.bf16.msra.mxu0 %v1554_v43  ;;  %v207_v43 = vrot.slane %v198_v40, %v206_v41  ;;  %v479_v40 = vsub.s32 3, %v1850_v38 }
  0x76   :  { %1092 = vmatprep.subr.bf16.mxu0 %v1562_v44 }
  0x79   :  { %1093 = vmatpush1.bf16.msra.mxu0 %v1560_v45 }
  0x7a   :  { %1094 = vmatprep.subr.bf16.mxu0 %v1568_v46 }
  0x7d   :  { %1095 = vmatpush1.bf16.msra.mxu0 %v1566_v47 }
  0x7e   :  { %1096 = vmatprep.subr.bf16.mxu0 %v1574_v48 }
  0x81   :  { %1097 = vmatpush1.bf16.msra.mxu0 %v1572_v49 }
  0x82   :  { %1098 = vmatprep.subr.bf16.mxu0 %v1580_v50 }
  0x85   :  { %1099 = vmatpush1.bf16.msra.mxu0 %v1578_v51 }
  0x86   :  { %1100 = vmatprep.subr.bf16.mxu0 %v1586_v52 }
  0x89   :  { %1101 = vmatpush1.bf16.msra.mxu0 %v1584_v53  ;;  %v1608_v53 = vld [vmem:[#allocation6 + $0x10] ss:$28 sps:$4 sm:$0xff]  }
  0x8a   :  { %1102 = vmatprep.subr.bf16.mxu0 %v1592_v54  ;;  %v1612_v54 = vld [vmem:[#allocation6 + $0x18] ss:$28 sps:$4 sm:$0xff]  }
  0x8d   :  { %1103 = vmatpush1.bf16.msra.mxu0 %v1590_v55 }
  0x8e   :  { %1104 = vmatprep.subr.bf16.mxu0 %v1598_v27  ;;  %v1657_v27 = vld [vmem:[#allocation6 + $0x278] ss:$28 sps:$4 sm:$0xff]  }
  0x91   :  { %1105 = vmatpush1.bf16.msra.mxu0 %v1596_v29  ;;  %v1660_v29 = vld [vmem:[#allocation6 + $0x2b0] ss:$28 sps:$4 sm:$0xff]  }
  0x92   :  { %1106 = vmatprep.subr.bf16.mxu0 %v1604_v31  ;;  %v1663_v31 = vld [vmem:[#allocation6 + $0x2e8] ss:$28 sps:$4 sm:$0xff]  }
  0x95   :  { %1107 = vmatpush1.bf16.msra.mxu0 %v1602_v33  ;;  %v1666_v33 = vld [vmem:[#allocation6 + $0x320] ss:$28 sps:$4 sm:$0xff]  }
  0x96   :  { %1158 = vmatprep.subr.bf16.mxu0 %v1610_v35  ;;  %v1669_v35 = vld [vmem:[#allocation6 + $0x358] ss:$28 sps:$4 sm:$0xff]  }
 0x12b   :  { %v174_v57 = vpop.f32.mrb[0].mxu0 }
 0x12c   :  { %v175_v58 = vadd.f32 %v1280_v56, %v174_v57  ;;  %v1466_v59 = vpop.f32.mrb[1].mxu0  ;;  %v1615_v56 = vld [vmem:[#allocation6 + $0x4c] ss:$28 sps:$4 sm:$0xff]  }
 0x12d   :  { %v177_v60 = vpop.f32.mrb[2].mxu0  ;;  %v1616_v57 = vld [vmem:[#allocation6 + $0x210] ss:$28 sps:$4 sm:$0xff]  }
 0x12e   :  { %v180_v61 = vmax.f32 %v175_v58, 0.0  ;;  %v1467_v62 = vpop.f32.mrb[3].mxu0  ;;  %v1613_v58 = vld [vmem:[#allocation6 + $0x48] ss:$28 sps:$4 sm:$0xff]   ;;  %v1617_v59 = vld [vmem:[#allocation6 + $0x50] ss:$28 sps:$4 sm:$0xff]  }
 0x12f   :  { %v1620_v60 = vld [vmem:[#allocation6 + $0x84] ss:$28 sps:$4 sm:$0xff]  }
 0x130   :  { %v181_v0 = vpack.c.bf16 %v180_v61, %v180_v61  ;;  %v1621_v61 = vld [vmem:[#allocation6 + $0x248] ss:$28 sps:$4 sm:$0xff]   ;;  %v1618_v62 = vld [vmem:[#allocation6 + $0x80] ss:$28 sps:$4 sm:$0xff]  }
 0x132   :  { %323 = vmatmul.mubr.bf16.vlgmr.msra.gmra.mrb[0].mxu1 %v181_v0  ;;  %v1625_v0 = vld [vmem:[#allocation6 + $0xbc] ss:$28 sps:$4 sm:$0xff]  }
 0x133   :  { %1118 = vmatpush1.bf16.msra.mxu1 %v1515_v63  ;;  %v1622_v63 = vld [vmem:[#allocation6 + $0x88] ss:$28 sps:$4 sm:$0xff]  }
 0x134   :  { %1119 = vmatprep.subr.bf16.mxu1 %v1523_v1  ;;  %v1626_v1 = vld [vmem:[#allocation6 + $0x280] ss:$28 sps:$4 sm:$0xff]  }
 0x137   :  { %1120 = vmatpush1.bf16.msra.mxu1 %v1521_v2  ;;  %v1623_v2 = vld [vmem:[#allocation6 + $0xb8] ss:$28 sps:$4 sm:$0xff]  }
 0x138   :  { %1121 = vmatprep.subr.bf16.mxu1 %v1529_v3  ;;  %v1627_v3 = vld [vmem:[#allocation6 + $0xc0] ss:$28 sps:$4 sm:$0xff]  }
 0x13b   :  { %1122 = vmatpush1.bf16.msra.mxu1 %v1527_v4  ;;  %v1630_v4 = vld [vmem:[#allocation6 + $0xf4] ss:$28 sps:$4 sm:$0xff]  }
 0x13c   :  { %1123 = vmatprep.subr.bf16.mxu1 %v1535_v5  ;;  %v1631_v5 = vld [vmem:[#allocation6 + $0x2b8] ss:$28 sps:$4 sm:$0xff]  }
 0x13f   :  { %1124 = vmatpush1.bf16.msra.mxu1 %v1533_v6  ;;  %v1628_v6 = vld [vmem:[#allocation6 + $0xf0] ss:$28 sps:$4 sm:$0xff]  }
 0x140   :  { %1125 = vmatprep.subr.bf16.mxu1 %v1541_v7  ;;  %v1632_v7 = vld [vmem:[#allocation6 + $0xf8] ss:$28 sps:$4 sm:$0xff]  }
 0x143   :  { %1126 = vmatpush1.bf16.msra.mxu1 %v1539_v8  ;;  %v1635_v8 = vld [vmem:[#allocation6 + $0x12c] ss:$28 sps:$4 sm:$0xff]  }
 0x144   :  { %1127 = vmatprep.subr.bf16.mxu1 %v1547_v9  ;;  %v1636_v9 = vld [vmem:[#allocation6 + $0x2f0] ss:$28 sps:$4 sm:$0xff]  }
 0x147   :  { %1128 = vmatpush1.bf16.msra.mxu1 %v1545_v10  ;;  %v1633_v10 = vld [vmem:[#allocation6 + $0x128] ss:$28 sps:$4 sm:$0xff]  }
 0x148   :  { %1129 = vmatprep.subr.bf16.mxu1 %v1553_v11  ;;  %v1637_v11 = vld [vmem:[#allocation6 + $0x130] ss:$28 sps:$4 sm:$0xff]  }
 0x14b   :  { %1130 = vmatpush1.bf16.msra.mxu1 %v1551_v12  ;;  %v1640_v12 = vld [vmem:[#allocation6 + $0x164] ss:$28 sps:$4 sm:$0xff]  }
 0x14c   :  { %1131 = vmatprep.subr.bf16.mxu1 %v1559_v13  ;;  %v1641_v13 = vld [vmem:[#allocation6 + $0x328] ss:$28 sps:$4 sm:$0xff]  }
 0x14f   :  { %1132 = vmatpush1.bf16.msra.mxu1 %v1557_v14  ;;  %v1638_v14 = vld [vmem:[#allocation6 + $0x160] ss:$28 sps:$4 sm:$0xff]  }
 0x150   :  { %1133 = vmatprep.subr.bf16.mxu1 %v1565_v15  ;;  %v1642_v15 = vld [vmem:[#allocation6 + $0x168] ss:$28 sps:$4 sm:$0xff]  }
 0x153   :  { %1134 = vmatpush1.bf16.msra.mxu1 %v1563_v16  ;;  %v1645_v16 = vld [vmem:[#allocation6 + $0x19c] ss:$28 sps:$4 sm:$0xff]  }
 0x154   :  { %1135 = vmatprep.subr.bf16.mxu1 %v1571_v17  ;;  %v1646_v17 = vld [vmem:[#allocation6 + $0x360] ss:$28 sps:$4 sm:$0xff]  }
 0x157   :  { %1136 = vmatpush1.bf16.msra.mxu1 %v1569_v18  ;;  %v1643_v18 = vld [vmem:[#allocation6 + $0x198] ss:$28 sps:$4 sm:$0xff]  }
 0x158   :  { %1137 = vmatprep.subr.bf16.mxu1 %v1577_v19  ;;  %v1647_v19 = vld [vmem:[#allocation6 + $0x1a0] ss:$28 sps:$4 sm:$0xff]  }
 0x15b   :  { %1138 = vmatpush1.bf16.msra.mxu1 %v1575_v20  ;;  %v1650_v20 = vld [vmem:[#allocation6 + $0x1d4] ss:$28 sps:$4 sm:$0xff]  }
 0x15c   :  { %1139 = vmatprep.subr.bf16.mxu1 %v1583_v21  ;;  %v1648_v21 = vld [vmem:[#allocation6 + $0x1d0] ss:$28 sps:$4 sm:$0xff]  }
 0x15f   :  { %1140 = vmatpush1.bf16.msra.mxu1 %v1581_v22  ;;  %v1653_v22 = vld [vmem:[#allocation6 + $0x20c] ss:$28 sps:$4 sm:$0xff]  }
 0x160   :  { %1141 = vmatprep.subr.bf16.mxu1 %v1589_v23  ;;  %v1651_v23 = vld [vmem:[#allocation6 + $0x208] ss:$28 sps:$4 sm:$0xff]  }
 0x163   :  { %1142 = vmatpush1.bf16.msra.mxu1 %v1587_v24  ;;  %v1656_v24 = vld [vmem:[#allocation6 + $0x244] ss:$28 sps:$4 sm:$0xff]  }
 0x164   :  { %1143 = vmatprep.subr.bf16.mxu1 %v1595_v25  ;;  %v1654_v25 = vld [vmem:[#allocation6 + $0x240] ss:$28 sps:$4 sm:$0xff]  }
 0x167   :  { %1144 = vmatpush1.bf16.msra.mxu1 %v1593_v26  ;;  %v1659_v26 = vld [vmem:[#allocation6 + $0x27c] ss:$28 sps:$4 sm:$0xff]  }
 0x168   :  { %1145 = vmatprep.subr.bf16.mxu1 %v1601_v28  ;;  %v1662_v28 = vld [vmem:[#allocation6 + $0x2b4] ss:$28 sps:$4 sm:$0xff]  }
 0x16b   :  { %1146 = vmatpush1.bf16.msra.mxu1 %v1599_v30  ;;  %v1665_v30 = vld [vmem:[#allocation6 + $0x2ec] ss:$28 sps:$4 sm:$0xff]  }
 0x16c   :  { %1147 = vmatprep.subr.bf16.mxu1 %v1607_v32  ;;  %v1668_v32 = vld [vmem:[#allocation6 + $0x324] ss:$28 sps:$4 sm:$0xff]  }
 0x16f   :  { %1148 = vmatpush1.bf16.msra.mxu1 %v1605_v34  ;;  %v1671_v34 = vld [vmem:[#allocation6 + $0x35c] ss:$28 sps:$4 sm:$0xff]  }
 0x170   :  { %1426 = vmatprep.subr.bf16.mxu1 %v1611_v36  ;;  %v475_v36 = vsub.s32 2, %v1850_v38 }
 0x205   :  { %v324_v44 = vpop.f32.mrb[0].mxu1 }
 0x206   :  { %v325_v45 = vadd.f32 %v324_v44, %v203_v42  ;;  %v326_v46 = vpop.f32.mrb[1].mxu1  ;;  %v468_v42 = vrot.slane %v463_v37, %v202_v39  ;;  %v472_v44 = vrot.slane %v463_v37, %v206_v41 }
 0x207   :  { %v327_v47 = vadd.f32 %v326_v46, %v207_v43  ;;  %v328_v48 = vpop.f32.mrb[2].mxu1  ;;  %v476_v43 = vrot.slane %v463_v37, %v475_v36 }
 0x208   :  { %v331_v49 = vmax.f32 %v325_v45, 0.0  ;;  %v329_v50 = vpop.f32.mrb[3].mxu1  ;;  %v480_v45 = vrot.slane %v463_v37, %v479_v40 }
 0x209   :  { %v332_v51 = vmax.f32 %v327_v47, 0.0 }
 0x20a   :  { %v1861_v55 = vpack.c.bf16 %v331_v49, %v331_v49 }
 0x20b   :  { %v334_v52 = vpack.c.bf16 %v332_v51, %v332_v51 }
 0x20d   :  { %1108 = vmatprep.mubr.bf16.mxu0 %v334_v52  ;;  %1149 = vmatprep.mubr.bf16.mxu1 %v334_v52 }
 0x20e   :  { %1109 = vmatmul.mubr.bf16.vlgmr.msra.gmra.mrb[4].mxu0 %v1861_v55  ;;  %1150 = vmatmul.mubr.bf16.vlgmr.msra.gmra.mrb[4].mxu1 %v1861_v55 }
 0x20f   :  { %1159 = vmatpush1.bf16.msra.mxu0 %v1608_v53  ;;  %1427 = vmatpush3.bf16.msra.mxu1 %v1612_v54 }
 0x210   :  { %1190 = vmatprep.mubr.bf16.mxu0 %v334_v52  ;;  %1231 = vmatprep.mubr.bf16.mxu1 %v334_v52 }
 0x211   :  { %1160 = vmatprep.subr.bf16.mxu0 %v1615_v56  ;;  %1428 = vmatprep.subr.bf16.mxu1 %v1616_v57 }
 0x213   :  { %1161 = vmatpush1.bf16.msra.mxu0 %v1613_v58  ;;  %1429 = vmatpush3.bf16.msra.mxu1 %v1617_v59 }
 0x214   :  { %1162 = vmatprep.subr.bf16.mxu0 %v1620_v60  ;;  %1430 = vmatprep.subr.bf16.mxu1 %v1621_v61 }
 0x217   :  { %1163 = vmatpush1.bf16.msra.mxu0 %v1618_v62  ;;  %1431 = vmatpush3.bf16.msra.mxu1 %v1622_v63 }
 0x218   :  { %1164 = vmatprep.subr.bf16.mxu0 %v1625_v0  ;;  %1432 = vmatprep.subr.bf16.mxu1 %v1626_v1 }
 0x21b   :  { %1165 = vmatpush1.bf16.msra.mxu0 %v1623_v2  ;;  %1433 = vmatpush3.bf16.msra.mxu1 %v1627_v3 }
 0x21c   :  { %1166 = vmatprep.subr.bf16.mxu0 %v1630_v4  ;;  %1434 = vmatprep.subr.bf16.mxu1 %v1631_v5 }
 0x21f   :  { %1167 = vmatpush1.bf16.msra.mxu0 %v1628_v6  ;;  %1435 = vmatpush3.bf16.msra.mxu1 %v1632_v7 }
 0x220   :  { %1168 = vmatprep.subr.bf16.mxu0 %v1635_v8  ;;  %1436 = vmatprep.subr.bf16.mxu1 %v1636_v9  ;;  %v491_v8 = vsub.s32 6, %v1850_v38 }
 0x223   :  { %1169 = vmatpush1.bf16.msra.mxu0 %v1633_v10  ;;  %1437 = vmatpush3.bf16.msra.mxu1 %v1637_v11  ;;  %v492_v10 = vrot.slane %v463_v37, %v491_v8 }
 0x224   :  { %1170 = vmatprep.subr.bf16.mxu0 %v1640_v12  ;;  %1438 = vmatprep.subr.bf16.mxu1 %v1641_v13 }
 0x227   :  { %1171 = vmatpush1.bf16.msra.mxu0 %v1638_v14  ;;  %1439 = vmatpush3.bf16.msra.mxu1 %v1642_v15 }
 0x228   :  { %1172 = vmatprep.subr.bf16.mxu0 %v1645_v16  ;;  %1440 = vmatprep.subr.bf16.mxu1 %v1646_v17 }
 0x22b   :  { %1173 = vmatpush1.bf16.msra.mxu0 %v1643_v18  ;;  %1441 = vmatpush3.bf16.msra.mxu1 %v1647_v19 }
 0x22c   :  { %1174 = vmatprep.subr.bf16.mxu0 %v1650_v20  ;;  %v483_v20 = vsub.s32 4, %v1850_v38 }
 0x22e   :  { %1232 = vmatmul.mubr.bf16.vlgmr.msra.gmra.mrb[8].mxu1 %v1861_v55 }
 0x22f   :  { %1175 = vmatpush1.bf16.msra.mxu0 %v1648_v21  ;;  %v487_v21 = vsub.s32 5, %v1850_v38 }
 0x230   :  { %1176 = vmatprep.subr.bf16.mxu0 %v1653_v22  ;;  %v484_v22 = vrot.slane %v463_v37, %v483_v20 }
 0x233   :  { %1177 = vmatpush1.bf16.msra.mxu0 %v1651_v23  ;;  %v488_v23 = vrot.slane %v463_v37, %v487_v21 }
 0x234   :  { %1178 = vmatprep.subr.bf16.mxu0 %v1656_v24 }
 0x237   :  { %1179 = vmatpush1.bf16.msra.mxu0 %v1654_v25 }
 0x238   :  { %1180 = vmatprep.subr.bf16.mxu0 %v1659_v26 }
 0x23b   :  { %1181 = vmatpush1.bf16.msra.mxu0 %v1657_v27 }
 0x23c   :  { %1182 = vmatprep.subr.bf16.mxu0 %v1662_v28 }
 0x23f   :  { %1183 = vmatpush1.bf16.msra.mxu0 %v1660_v29 }
 0x240   :  { %1184 = vmatprep.subr.bf16.mxu0 %v1665_v30 }
 0x243   :  { %1185 = vmatpush1.bf16.msra.mxu0 %v1663_v31 }
 0x244   :  { %1186 = vmatprep.subr.bf16.mxu0 %v1668_v32 }
 0x247   :  { %1187 = vmatpush1.bf16.msra.mxu0 %v1666_v33 }
 0x248   :  { %1188 = vmatprep.subr.bf16.mxu0 %v1671_v34 }
 0x24b   :  { %1189 = vmatpush1.bf16.msra.mxu0 %v1669_v35 }
 0x24e   :  { %1191 = vmatmul.mubr.bf16.vlgmr.msra.gmra.mrb[8].mxu0 %v1861_v55 }
 0x2e1   :  { %v1110_v46 = vpop.f32.mrb[4].mxu0  ;;  %v1151_v47 = vpop.f32.mrb[4].mxu1 }
 0x2e2   :  { %v1111_v48 = vadd.f32 %v1110_v46, %v468_v42  ;;  %v1152_v49 = vadd.f32 %v1151_v47, %v476_v43  ;;  %v1112_v50 = vpop.f32.mrb[5].mxu0  ;;  %v1153_v51 = vpop.f32.mrb[5].mxu1 }
 0x2e3   :  { %v1113_v52 = vadd.f32 %v1112_v50, %v472_v44  ;;  %v1154_v53 = vadd.f32 %v1153_v51, %v480_v45  ;;  %v1114_v54 = vpop.f32.mrb[6].mxu0  ;;  %v1155_v55 = vpop.f32.mrb[6].mxu1 }
 0x2e4   :  { %v1239_v56 = vmul.f32 0.5, %v1111_v48  ;;  %v1241_v57 = vmul.f32 0.5, %v1152_v49  ;;  %v1115_v58 = vpop.f32.mrb[7].mxu0  ;;  %v1156_v59 = vpop.f32.mrb[7].mxu1 }
 0x2e5   :  { %v1240_v39 = vmul.f32 0.5, %v1113_v52  ;;  %v1242_v60 = vmul.f32 0.5, %v1154_v53 }
 0x2e6   :  { %1672 = vtanh.f32 %v1239_v56 }
 0x2e7   :  { %1674 = vtanh.f32 %v1241_v57 }
 0x2e8   :  { %1676 = vtanh.f32 %v1240_v39 }
 0x2e9   :  { %1678 = vtanh.f32 %v1242_v60 }
 0x2f0   :  { %v1673_v41 = vpop.eup %1672 }
 0x2f1   :  { %v1675_v61 = vpop.eup %1674  ;;  %v1253_v62 = vadd.f32 1.0, %v1673_v41 }
 0x2f2   :  { %v1677_v63 = vpop.eup %1676  ;;  %v1255_v0 = vadd.f32 1.0, %v1675_v61 }
 0x2f3   :  { %v1679_v1 = vpop.eup %1678  ;;  %v1260_v2 = vmul.f32 0.5, %v1253_v62  ;;  %v1254_v3 = vadd.f32 1.0, %v1677_v63 }
 0x2f4   :  { %v1262_v4 = vmul.f32 0.5, %v1255_v0  ;;  %v1256_v5 = vadd.f32 1.0, %v1679_v1 }
 0x2f5   :  { %1267 = vst [vmem:[%s1907_s7] sm:$0xff] %v1260_v2  ;;  %v1261_v6 = vmul.f32 0.5, %v1254_v3 }
 0x2f6   :  { %1269 = vst [vmem:[%s1907_s7 + $0x10] sm:$0xff] %v1262_v4  ;;  %v1263_v7 = vmul.f32 0.5, %v1256_v5 }
 0x2f7   :  { %1268 = vst [vmem:[%s1907_s7 + $0x8] sm:$0xff] %v1261_v6 }
 0x2f8   :  { %1270 = vst [vmem:[%s1907_s7 + $0x18] sm:$0xff] %v1263_v7 }
 0x301   :  { %v1442_v9 = vpop.f32.mrb[8].mxu1 }
 0x302   :  { %v1443_v11 = vpop.f32.mrb[9].mxu1 }
 0x303   :  { %v1444_v12 = vadd.f32 %v1443_v11, %v1442_v9  ;;  %v1445_v13 = vpop.f32.mrb[10].mxu1 }
 0x304   :  { %v1446_v14 = vpop.f32.mrb[11].mxu1 }
 0x305   :  { %v1234_v15 = vadd.f32 %v1444_v12, %v492_v10 }
 0x307   :  { %v1245_v16 = vmul.f32 0.5, %v1234_v15 }
 0x309   :  { %1680 = vtanh.f32 %v1245_v16 }
 0x313   :  { %v1681_v17 = vpop.eup %1680 }
 0x314   :  { %v1259_v18 = vadd.f32 1.0, %v1681_v17 }
 0x316   :  { %v1266_v19 = vmul.f32 0.5, %v1259_v18 }
 0x318   :  { %1273 = vst [vmem:[%s1907_s7 + $0x30] sm:$0xff] %v1266_v19 }
 0x321   :  { %v1192_v24 = vpop.f32.mrb[8].mxu0 }
 0x322   :  { %v1193_v25 = vadd.f32 %v1192_v24, %v484_v22  ;;  %v1194_v26 = vpop.f32.mrb[9].mxu0 }
 0x323   :  { %v1195_v27 = vadd.f32 %v1194_v26, %v488_v23  ;;  %v1196_v28 = vpop.f32.mrb[10].mxu0 }
 0x324   :  { %v1243_v29 = vmul.f32 0.5, %v1193_v25  ;;  %v1197_v30 = vpop.f32.mrb[11].mxu0 }
 0x325   :  { %v1244_v31 = vmul.f32 0.5, %v1195_v27 }
 0x326   :  { %1682 = vtanh.f32 %v1243_v29 }
 0x327   :  { %1684 = vtanh.f32 %v1244_v31 }
 0x330   :  { %v1683_v32 = vpop.eup %1682 }
 0x331   :  { %v1685_v33 = vpop.eup %1684  ;;  %v1257_v34 = vadd.f32 1.0, %v1683_v32 }
 0x332   :  { %v1258_v35 = vadd.f32 1.0, %v1685_v33 }
 0x333   :  { %v1264_v36 = vmul.f32 0.5, %v1257_v34 }
 0x334   :  { %v1265_v40 = vmul.f32 0.5, %v1258_v35 }
 0x335   :  { %1271 = vst [vmem:[%s1907_s7 + $0x20] sm:$0xff] %v1264_v36 }
 0x336   :  { %1272 = vst [vmem:[%s1907_s7 + $0x28] sm:$0xff] %v1265_v40 }
 0x337   :  { %1278 = vsyncpa [#allocation3], 1 }
 0x338   :  { %1279 = vsyncpa [#allocation5], 1 }

</bundles_post_ra>
